<compile_context>
chip_gen: v6e
topology: v6e:2x2x1
jax: 0.10.0
libtpu: 0.0.40
codegen_flags: <defaults>
</compile_context>

<pallas_src>
import math

import jax
import jax.numpy as jnp
from jax import lax
from jax.experimental import pallas as pl
from jax.experimental.pallas import tpu as pltpu


# Below this B*K*N scale a plain fused XLA dot beats any pallas_call
# (per-step overhead ~0.35 us + extra pad/slice ops dominate).
_FAST_PATH_FLOP_SCALE = 1 << 20


def _round_up(x: int, m: int) -> int:
    return ((x + m - 1) // m) * m


def _vmem_capacity_bytes() -> int:
    # Generation-aware budget: 128 MiB on v5e/v6e, 64 MiB per TC on v7x.
    try:
        return int(pltpu.get_tpu_info().vmem_capacity_bytes)
    except Exception:
        return 64 * 1024 * 1024  # conservative (v7x-sized) fallback


# ---------------------------------------------------------------------------
# Kernels. Weight block arrives in torch (N, K) layout: shape (tn, tk).
# Contraction is dim 1 of x with dim 1 of w -> (tm, tn); no in-kernel .T and
# no wrapper transpose.
# ---------------------------------------------------------------------------
def _linear_kernel_direct(x_ref, w_ref, o_ref):
    # f32 output: accumulate straight into the resident output block.
    @pl.when(pl.program_id(2) == 0)
    def _init():
        o_ref[...] = jnp.zeros_like(o_ref)

    o_ref[...] += lax.dot_general(
        x_ref[...], w_ref[...],
        dimension_numbers=(((1,), (1,)), ((), ())),
        preferred_element_type=jnp.float32,
    )


def _linear_kernel_scratch(x_ref, w_ref, o_ref, acc_ref):
    # Narrow output dtypes: accumulate in an f32 scratch, cast on the last step.
    @pl.when(pl.program_id(2) == 0)
    def _init():
        acc_ref[...] = jnp.zeros_like(acc_ref)

    acc_ref[...] += lax.dot_general(
        x_ref[...], w_ref[...],
        dimension_numbers=(((1,), (1,)), ((), ())),
        preferred_element_type=jnp.float32,
    )

    @pl.when(pl.program_id(2) == pl.num_programs(2) - 1)
    def _finalize():
        o_ref[...] = acc_ref[...].astype(o_ref.dtype)


# ---------------------------------------------------------------------------
# Wrapper
# ---------------------------------------------------------------------------
def linear_forward(state, weight, bias=None, *, tm=None, tn=None, tk=None,
                   compute_dtype=None, force_pallas=False):
    """LinearNetwork forward: y = state @ weight.T (+ bias).

    state:  (..., n_input)
    weight: (n_output, n_input)   -- torch nn.Linear layout (NOT transposed)
    bias:   optional (n_output,)
    compute_dtype: e.g. jnp.bfloat16 to feed the MXU at bf16 peak on v6e/v7x
        (accumulation stays f32). Default None keeps exact f32 semantics.
    """
    *lead, K = state.shape
    N, K_w = weight.shape
    assert K == K_w, "state feature dim must match weight fan-in"

    x2d = state.reshape(-1, K)
    B = x2d.shape[0]
    out_dtype = state.dtype

    # ---- Small-shape fast path: fused XLA dot, no pallas_call / pad / slice.
    if not force_pallas and (B * K * N) <= _FAST_PATH_FLOP_SCALE:
        out = jnp.dot(x2d, weight.T)
        if bias is not None:
            out = out + bias.astype(out.dtype)
        return out.reshape(*lead, N)

    # ---- Pallas tiled-matmul path -----------------------------------------
    x = x2d if compute_dtype is None else x2d.astype(compute_dtype)
    w = weight if compute_dtype is None else weight.astype(compute_dtype)
    in_itemsize = jnp.dtype(x.dtype).itemsize
    out_itemsize = jnp.dtype(out_dtype).itemsize
    direct_f32 = jnp.dtype(out_dtype) == jnp.dtype(jnp.float32)

    M_r, K_r, N_r = _round_up(B, 8), _round_up(K, 128), _round_up(N, 128)

    tn_user = tn is not None
    tm = tm if tm is not None else min(512, M_r)
    tn = tn if tn is not None else min(512, N_r)
    tk = tk if tk is not None else min(1024, K_r)
    tm = _round_up(min(tm, M_r), 8)
    tn = _round_up(min(tn, N_r), 128)
    tk = _round_up(min(tk, K_r), 128)

    # v7x has 2 TensorCores sharded over the parallel grid axes: if the M axis
    # collapses to a single block, split N so both cores get work.
    if (not tn_user) and (M_r + tm - 1) // tm == 1 and tn >= N_r and N_r >= 256:
        tn = max(128, ((N_r // 2) // 128) * 128)

    vmem_cap = _vmem_capacity_bytes()
    budget = vmem_cap // 2  # ~32 MiB on v7x, ~64 MiB on v5e/v6e

    def _footprint(tm_, tn_, tk_, wbufs):
        f = in_itemsize * (2 * tm_ * tk_ + wbufs * tk_ * tn_)
        f += out_itemsize * 2 * tm_ * tn_
        if not direct_f32:
            f += 4 * tm_ * tn_  # f32 accumulator scratch
        return f

    # Shrink tiles (tk, then tn, then tm) until the double-buffered footprint
    # fits the generation-aware budget. Assume 3 weight buffers (worst case).
    while _footprint(tm, tn, tk, 3) > budget:
        if tk > 128:
            tk = max(128, ((tk // 2) // 128) * 128)
        elif tn > 128:
            tn = max(128, ((tn // 2) // 128) * 128)
        elif tm > 8:
            tm = max(8, ((tm // 2) // 8) * 8)
        else:
            break

    Mp, Kp, Np = _round_up(B, tm), _round_up(K, tk), _round_up(N, tn)

    xp = x if (Mp, Kp) == (B, K) else jnp.pad(x, ((0, Mp - B), (0, Kp - K)))
    wp = w if (Np, Kp) == (N, K) else jnp.pad(w, ((0, Np - N), (0, Kp - K)))

    n_i, n_j, k_steps = Mp // tm, Np // tn, Kp // tk
    grid = (n_i, n_j, k_steps)

    # Deeper weight pipelining when many short K steps (small tm): keeps the
    # (tk, tn) weight DMA hidden behind short per-step compute.
    w_index = lambda i, j, k: (j, k)
    wbufs = 3 if (k_steps >= 3 and tm <= 128) else 2
    w_spec = pl.BlockSpec((tn, tk), w_index)
    if wbufs == 3:
        try:
            w_spec = pl.BlockSpec((tn, tk), w_index, pipeline_mode=pl.Buffered(3))
        except (TypeError, AttributeError):
            wbufs = 2  # older API: fall back to default double-buffering

    kernel = _linear_kernel_direct if direct_f32 else _linear_kernel_scratch
    scratch = [] if direct_f32 else [pltpu.VMEM((tm, tn), jnp.float32)]

    footprint = _footprint(tm, tn, tk, wbufs)
    vmem_limit = min(int(vmem_cap * 0.9), max(8 * 1024 * 1024, 2 * footprint))

    cost = pl.CostEstimate(
        flops=2 * B * K * N,
        transcendentals=0,
        # x is re-read once per N block, W once per M block; output written once.
        bytes_accessed=in_itemsize * (Mp * Kp * n_j + Np * Kp * n_i)
        + out_itemsize * Mp * Np,
    )

    out_padded = pl.pallas_call(
        kernel,
        out_shape=jax.ShapeDtypeStruct((Mp, Np), out_dtype),
        grid=grid,
        in_specs=[
            pl.BlockSpec((tm, tk), lambda i, j, k: (i, k)),
            w_spec,
        ],
        out_specs=pl.BlockSpec((tm, tn), lambda i, j, k: (i, j)),
        scratch_shapes=scratch,
        compiler_params=pltpu.CompilerParams(
            dimension_semantics=("parallel", "parallel", "arbitrary"),
            vmem_limit_bytes=vmem_limit,
        ),
        cost_estimate=cost,
    )(xp, wp)

    out = out_padded[:B, :N]
    if bias is not None:
        out = out + bias.astype(out.dtype)
    return out.reshape(*lead, N)


def xavier_uniform(key, n_output, n_input, gain=1.0, dtype=jnp.float32):
    # Matches torch.nn.init.xavier_uniform_ on a (n_output, n_input) weight:
    # bound = gain * sqrt(6 / (fan_in + fan_out)), U(-bound, bound).
    bound = gain * math.sqrt(6.0 / (n_input + n_output))
    return jax.random.uniform(
        key, (n_output, n_input), dtype=dtype, minval=-bound, maxval=bound
    )


if __name__ == "__main__":
    key = jax.random.PRNGKey(0)
    k_x, k_w, k_x2, k_w2, k_x3, k_w3 = jax.random.split(key, 6)

    # --- Module-sized shapes (input_shape[-1]=32, output_shape[0]=16) -------
    batch, n_input, n_output = 8, 32, 16
    state = jax.random.normal(k_x, (batch, n_input), dtype=jnp.float32)
    weight = xavier_uniform(k_w, n_output, n_input, gain=1.0)
    ref = jnp.dot(state, weight.T, precision=jax.lax.Precision.HIGHEST)

    # Fast path (default for tiny shapes).
    out_fast = jax.block_until_ready(linear_forward(state, weight))
    assert out_fast.shape == (batch, n_output)
    assert jnp.allclose(out_fast, ref, atol=1e-4, rtol=1e-4)

    # Force the Pallas path on the same tiny shapes (correctness of padding).
    out_pk = jax.block_until_ready(linear_forward(state, weight, force_pallas=True))
    assert out_pk.shape == (batch, n_output)
    assert jnp.allclose(out_pk, ref, atol=1e-4, rtol=1e-4)

    # --- Larger: multi-N-block grid (exercises the 2-TC split heuristic) ----
    B2, K2, N2 = 256, 512, 384
    state2 = jax.random.normal(k_x2, (B2, K2), dtype=jnp.float32)
    weight2 = xavier_uniform(k_w2, N2, K2, gain=1.0)
    out2 = jax.block_until_ready(linear_forward(state2, weight2))
    ref2 = jnp.dot(state2, weight2.T, precision=jax.lax.Precision.HIGHEST)
    assert out2.shape == (B2, N2)
    assert jnp.allclose(out2, ref2, atol=1e-3, rtol=1e-3)

    # --- Larger K: multi-step K accumulation directly into o_ref ------------
    B3, K3, N3 = 128, 4096, 256
    state3 = jax.random.normal(k_x3, (B3, K3), dtype=jnp.float32)
    weight3 = xavier_uniform(k_w3, N3, K3, gain=1.0)
    out3 = jax.block_until_ready(linear_forward(state3, weight3))
    ref3 = jnp.dot(state3, weight3.T, precision=jax.lax.Precision.HIGHEST)
    assert out3.shape == (B3, N3)
    assert jnp.allclose(out3, ref3, atol=2e-3, rtol=2e-3)

    print("KERNEL_OK")
</pallas_src>

<mosaic_0001>
module attributes {stable_mosaic.version = 11 : i64} {
  func.func @_linear_kernel_direct(%arg0: i32, %arg1: i32, %arg2: i32, %arg3: memref<8x128xf32, #tpu.memory_space<vmem>>, %arg4: memref<128x128xf32, #tpu.memory_space<vmem>>, %arg5: memref<8x128xf32, #tpu.memory_space<vmem>>) attributes {dimension_semantics = [#tpu.dimension_semantics<parallel>, #tpu.dimension_semantics<parallel>, #tpu.dimension_semantics<arbitrary>], iteration_bounds = array<i64: 1, 1, 1>, scalar_prefetch = 0 : i64, scratch_operands = 0 : i64, tpu.core_type = #tpu.core_type<tc>, window_params = [{transform_indices = @transform_0, window_bounds = array<i64: 8, 128>}, {transform_indices = @transform_1, window_bounds = array<i64: 128, 128>}, {transform_indices = @transform_2, window_bounds = array<i64: 8, 128>}]} {
    %c0_i32 = arith.constant 0 : i32
    %0 = arith.cmpi eq, %arg2, %c0_i32 : i32
    %1 = arith.extui %0 : i1 to i32
    %c0_i32_0 = arith.constant 0 : i32
    %2 = arith.cmpi ne, %1, %c0_i32_0 : i32
    scf.if %2 {
      %cst_8 = arith.constant 0.000000e+00 : f32
      %9 = vector.broadcast %cst_8 : f32 to vector<8x128xf32>
      %c0_9 = arith.constant 0 : index
      %c0_10 = arith.constant 0 : index
      %10 = vector.load %arg5[%c0_9, %c0_10] : memref<8x128xf32, #tpu.memory_space<vmem>>, vector<8x128xf32>
      tpu.vector_store %arg5[%c0_9, %c0_10], %9 {strides = array<i32>} : memref<8x128xf32, #tpu.memory_space<vmem>>, vector<8x128xf32>,
    } else {
    }
    %c0 = arith.constant 0 : index
    %c0_1 = arith.constant 0 : index
    %3 = vector.load %arg5[%c0, %c0_1] : memref<8x128xf32, #tpu.memory_space<vmem>>, vector<8x128xf32>
    %c0_2 = arith.constant 0 : index
    %c0_3 = arith.constant 0 : index
    %4 = vector.load %arg3[%c0_2, %c0_3] : memref<8x128xf32, #tpu.memory_space<vmem>>, vector<8x128xf32>
    %c0_4 = arith.constant 0 : index
    %c0_5 = arith.constant 0 : index
    %5 = vector.load %arg4[%c0_4, %c0_5] : memref<128x128xf32, #tpu.memory_space<vmem>>, vector<128x128xf32>
    %cst = arith.constant dense<0.000000e+00> : vector<8x128xf32>
    %6 = tpu.matmul %4, %5, %cst {dimension_numbers = #tpu.dot_dimension_numbers<[1], [1], [0], [0], [0, 0, 1, 0], [], []>} : vector<8x128xf32>, vector<128x128xf32>, vector<8x128xf32> -> vector<8x128xf32>
    %7 = arith.addf %3, %6 : vector<8x128xf32>
    %c0_6 = arith.constant 0 : index
    %c0_7 = arith.constant 0 : index
    %8 = vector.load %arg5[%c0_6, %c0_7] : memref<8x128xf32, #tpu.memory_space<vmem>>, vector<8x128xf32>
    tpu.vector_store %arg5[%c0_6, %c0_7], %7 {strides = array<i32>} : memref<8x128xf32, #tpu.memory_space<vmem>>, vector<8x128xf32>,
    return
  }
  func.func @transform_0(%arg0: i32, %arg1: i32, %arg2: i32) -> (i32, i32) {
    %c0_i32 = arith.constant 0 : i32
    return %arg0, %arg2 : i32, i32
  }
  func.func @transform_1(%arg0: i32, %arg1: i32, %arg2: i32) -> (i32, i32) {
    %c0_i32 = arith.constant 0 : i32
    return %arg1, %arg2 : i32, i32
  }
  func.func @transform_2(%arg0: i32, %arg1: i32, %arg2: i32) -> (i32, i32) {
    %c0_i32 = arith.constant 0 : i32
    return %arg0, %arg1 : i32, i32
  }
}

</mosaic_0001>

<bundles_post_ra>
// kernel: tpu_custom_call.1
= control target key start
LH: loop header
LB: loop body
LE: loop exit
PB: predicated region body
PF: predicated region fallthrough
CT: control target
= control target key end

     0   :  { %7 = vsyncpa [#allocation3], 0  ;;  %s305_s0 = inlined_call_operand.hbm [shape: f32[8,128], index: 0, kind: input, shape index: {}]   ;;  %s306_s1 = inlined_call_operand.hbm [shape: f32[128,128], index: 1, kind: input, shape index: {}]   ;;  %s307_s2 = inlined_call_operand.hbm [shape: f32[8,128], index: 2, kind: output, shape index: {}]  }
   0x1   :  { %8 = vsyncpa [#allocation6], 0 }
   0x2   :  { %9 = vsyncpa [#allocation4], 0  ;;  %s274_s9 = smov [#allocation2]   ;;  %s275_s11 = smov [#allocation5]  }
   0x3   :  { %s16_s10 = sshll.u32 %s274_s9, 4  ;;  %s25_s12 = sshll.u32 %s275_s11, 4  ;;  %s17_s10 = int_to_ptr.vmem [resolvable:$true] %s16_s10  ;;  %s26_s12 = int_to_ptr.vmem [resolvable:$true] %s25_s12 }
   0x4   :  { %s216_s13 = scalar_lea.vmem %s17_s10, 128  ;;  %p221_p1 = scmp.lt.s32.totalorder %s17_s10, %s17_s10 }
   0x5   :  { %p217_p0 = scmp.ne.s32.totalorder %s17_s10, %s216_s13  ;;  %p222_p2 = scmp.lt.s32.totalorder %s216_s13, %s216_s13 }
   0x7   :  { %p223_p3 = por %p222_p2, %p221_p1 }
   0x9   :  { %p224_p4 = pnand %p223_p3, %p217_p0 }
   0xb   :  { %227 = shalt.err (!%p224_p4)
}
   0xc   :  { %19 = dma.hbm_to_vmem [thread:$0]  %s305_s0, 128, %s17_s10, [#allocation3]  }
   0xd   :  { %s236_s16 = scalar_lea.vmem %s26_s12, 2048  ;;  %p241_p6 = scmp.lt.s32.totalorder %s26_s12, %s26_s12 }
   0xe   :  { %p237_p5 = scmp.ne.s32.totalorder %s26_s12, %s236_s16  ;;  %p242_p7 = scmp.lt.s32.totalorder %s236_s16, %s236_s16 }
  0x10   :  { %p243_p8 = por %p242_p7, %p241_p6 }
  0x12   :  { %p244_p9 = pnand %p243_p8, %p237_p5 }
  0x14   :  { %247 = shalt.err (!%p244_p9)
}
  0x15   :  { %s276_s17 = smov 128   ;;  %s277_s18 = smov 8  }
  0x16   :  { %31 = dma.hbm_to_vmem [thread:$0]  %s306_s1, 2048, %s26_s12, [#allocation6], %s276_s17, %s276_s17, %s277_s18  }
  0x17   :  { %268 = dma.done.wait [#allocation3], 128  }
  0x18   :  { %269 = vsyncadd [#allocation3], 4294967168 }
  0x19   :  { %270 = dma.done.wait [#allocation6], 2048  }
  0x1a   :  { %271 = vsyncadd [#allocation6], 4294965248  ;;  %v278_v0 = vmov 0.0   ;;  %vm279_vm0 = vmmov 0   ;;  %v60_v1 = vld [vmem:[#allocation5 + $0x78] sm:$0xff]  ;;  %v59_v2 = vld [vmem:[#allocation5 + $0x70] sm:$0xff] }
  0x1b   :  { %166 = vmatprep.subr.mxu0 %v278_v0  ;;  %198 = vmatprep.mubr.msk.f32.mxu0 %vm279_vm0, %v278_v0  ;;  %v58_v3 = vld [vmem:[#allocation5 + $0x68] sm:$0xff]  ;;  %v57_v4 = vld [vmem:[#allocation5 + $0x60] sm:$0xff]  ;;  %v56_v5 = vld [vmem:[#allocation5 + $0x58] sm:$0xff]  ;;  %s280_s0 = smov [#allocation7]  }
  0x1c   :  { %167 = vmatpush3.xpose.msra.mxu0 %v60_v1  ;;  %v55_v6 = vld [vmem:[#allocation5 + $0x50] sm:$0xff]  ;;  %v54_v7 = vld [vmem:[#allocation5 + $0x48] sm:$0xff]  ;;  %v53_v8 = vld [vmem:[#allocation5 + $0x40] sm:$0xff]  ;;  %s139_s1 = sshll.u32 %s280_s0, 4  ;;  %s140_s1 = int_to_ptr.vmem [resolvable:$true] %s139_s1 }
  0x1d   :  { %168 = vmatprep.subr.mxu0 %v278_v0  ;;  %v52_v9 = vld [vmem:[#allocation5 + $0x38] sm:$0xff]  ;;  %v51_v10 = vld [vmem:[#allocation5 + $0x30] sm:$0xff]  ;;  %v50_v11 = vld [vmem:[#allocation5 + $0x28] sm:$0xff]  ;;  %s248_s21 = scalar_lea.vmem %s140_s1, 128  ;;  %p253_p11 = scmp.lt.s32.totalorder %s140_s1, %s140_s1 }
  0x1e   :  { %v49_v12 = vld [vmem:[#allocation5 + $0x20] sm:$0xff]  ;;  %v48_v13 = vld [vmem:[#allocation5 + $0x18] sm:$0xff]  ;;  %v47_v14 = vld [vmem:[#allocation5 + $0x10] sm:$0xff]  ;;  %p249_p10 = scmp.ne.s32.totalorder %s140_s1, %s248_s21  ;;  %p254_p12 = scmp.lt.s32.totalorder %s248_s21, %s248_s21 }
  0x1f   :  { %v46_v15 = vld [vmem:[#allocation5 + $0x8] sm:$0xff]  ;;  %v45_v16 = vld [vmem:[#allocation5] sm:$0xff]  ;;  %v44_v17 = vld [vmem:[#allocation2] sm:$0xff] }
  0x20   :  { %169 = vmatpush3.xpose.msra.mxu0 %v59_v2  ;;  %p255_p13 = por %p254_p12, %p253_p11 }
  0x21   :  { %170 = vmatprep.subr.mxu0 %v278_v0 }
  0x22   :  { %p256_p0 = pnand %p255_p13, %p249_p10 }
  0x24   :  { %171 = vmatpush3.xpose.msra.mxu0 %v58_v3 }
  0x25   :  { %172 = vmatprep.subr.mxu0 %v278_v0 }
  0x28   :  { %173 = vmatpush3.xpose.msra.mxu0 %v57_v4 }
  0x29   :  { %174 = vmatprep.subr.mxu0 %v278_v0 }
  0x2c   :  { %175 = vmatpush3.xpose.msra.mxu0 %v56_v5 }
  0x2d   :  { %176 = vmatprep.subr.mxu0 %v278_v0 }
  0x30   :  { %177 = vmatpush3.xpose.msra.mxu0 %v55_v6 }
  0x31   :  { %178 = vmatprep.subr.mxu0 %v278_v0 }
  0x34   :  { %179 = vmatpush3.xpose.msra.mxu0 %v54_v7 }
  0x35   :  { %180 = vmatprep.subr.mxu0 %v278_v0 }
  0x38   :  { %181 = vmatpush3.xpose.msra.mxu0 %v53_v8 }
  0x39   :  { %182 = vmatprep.subr.mxu0 %v278_v0 }
  0x3c   :  { %183 = vmatpush3.xpose.msra.mxu0 %v52_v9 }
  0x3d   :  { %184 = vmatprep.subr.mxu0 %v278_v0 }
  0x40   :  { %185 = vmatpush3.xpose.msra.mxu0 %v51_v10 }
  0x41   :  { %186 = vmatprep.subr.mxu0 %v278_v0 }
  0x44   :  { %187 = vmatpush3.xpose.msra.mxu0 %v50_v11 }
  0x45   :  { %188 = vmatprep.subr.mxu0 %v278_v0 }
  0x48   :  { %189 = vmatpush3.xpose.msra.mxu0 %v49_v12 }
  0x49   :  { %190 = vmatprep.subr.mxu0 %v278_v0 }
  0x4c   :  { %191 = vmatpush3.xpose.msra.mxu0 %v48_v13 }
  0x4d   :  { %192 = vmatprep.subr.mxu0 %v278_v0 }
  0x50   :  { %193 = vmatpush3.xpose.msra.mxu0 %v47_v14 }
  0x51   :  { %194 = vmatprep.subr.mxu0 %v278_v0 }
  0x54   :  { %195 = vmatpush3.xpose.msra.mxu0 %v46_v15 }
  0x55   :  { %196 = vmatprep.subr.mxu0 %v278_v0 }
  0x58   :  { %197 = vmatpush3.xpose.msra.mxu0 %v45_v16 }
  0x5b   :  { %199 = vmatmul.mubr.f32.vlgmr.msra.gmra.mxu0 %v44_v17 }
 0x11b   :  { %v127_v18 = vpop.f32.mrf.mxu0 }
 0x11c   :  { %132 = vst [vmem:[#allocation7] sm:$0xff] %v127_v18 }
 0x11d   :  { %v200_v19 = vpop.f32.mrf.mxu0 }
 0x11e   :  { %259 = shalt.err (!%p256_p0)
}
 0x11f   :  { %142 = dma.vmem_to_hbm [thread:$0]  %s140_s1, 128, %s307_s2, [#allocation4]  }
 0x120   :  { %272 = dma.done.wait [#allocation4], 128  }
 0x121   :  { %273 = vsyncadd [#allocation4], 4294967168 }
 0x122   :  { %146 = vsyncpa [#allocation3], 1 }
 0x123   :  { %147 = vsyncpa [#allocation6], 1 }
 0x124   :  { %148 = vsyncpa [#allocation4], 1 }

</bundles_post_ra>
